<compile_context>
chip_gen: v6e
topology: v6e:2x2x1
jax: 0.10.0
libtpu: 0.0.40
codegen_flags: <defaults>
</compile_context>

<pallas_src>
import jax
import jax.numpy as jnp
import numpy as np
from jax.experimental import pallas as pl
from jax.experimental.pallas import tpu as pltpu

LN_EPS = 1e-5


def _round_up(n, m):
    return ((n + m - 1) // m) * m


def fft_patch_embed_kernel(
    x_ref,    # (T, patch_dim)        bf16 token tile
    m_ref,    # (patch_dim, freq_dim) bf16 real DFT linear map
    wbr_ref,  # (patch_dim, E)        bf16 fused branch weights [M@wf_fold | wp_fold]
    cs_ref,   # (1, E) f32  column sums  [colsum(wf_fold) | colsum(wp_fold)]
    bb_ref,   # (1, E) f32  branch biases [bf_fold | bp_fold]
    wo_ref,   # (E, E) f32  stacked folded output weights [wo_f ; wo_p]
    bo_ref,   # (1, E) f32  folded output bias
    out_ref,  # (T, E) f32
):
    x16 = x_ref[...]
    E = out_ref.shape[-1]
    E2 = E // 2

    # ---- input-side matmuls (bf16 operands, f32 accumulation) ----
    # ff  : per-patch fft2 as a linear map         (T, freq_dim) - only for LN stats
    # raw : un-normalized branch Linear outputs    (T, E) = [x@(M wf) | x@wp]
    ff = jnp.dot(x16, m_ref[...], preferred_element_type=jnp.float32)
    raw = jnp.dot(x16, wbr_ref[...], preferred_element_type=jnp.float32)

    # ---- LayerNorm-1 statistics (E[v^2]-mu^2 form -> independent reductions) ----
    x32 = x16.astype(jnp.float32)
    mu_x = jnp.mean(x32, axis=-1, keepdims=True)
    msq_x = jnp.mean(x32 * x32, axis=-1, keepdims=True)
    isg_x = jax.lax.rsqrt(msq_x - mu_x * mu_x + LN_EPS)

    mu_f = jnp.mean(ff, axis=-1, keepdims=True)
    msq_f = jnp.mean(ff * ff, axis=-1, keepdims=True)
    isg_f = jax.lax.rsqrt(msq_f - mu_f * mu_f + LN_EPS)

    # ---- apply LN-1 as a per-row scalar correction to the raw products ----
    # norm(v) @ W == (v @ W - mean(v) * colsum(W)) * rsqrt(var(v)+eps)
    lane = jax.lax.broadcasted_iota(jnp.int32, raw.shape, 1)
    is_f = lane < E2                        # lanes [0,E2): freq branch, [E2,E): patch
    mu1 = jnp.where(is_f, mu_f, mu_x)
    isg1 = jnp.where(is_f, isg_f, isg_x)
    lin = (raw - mu1 * cs_ref[...]) * isg1 + bb_ref[...]   # (T, E) = [fe_lin | pe_lin]

    # ---- LayerNorm-2 per E2-wide branch group (masked lane reductions) ----
    mask_f = is_f.astype(jnp.float32)
    lin_sq = lin * lin
    s_all = jnp.sum(lin, axis=-1, keepdims=True)
    q_all = jnp.sum(lin_sq, axis=-1, keepdims=True)
    s_f = jnp.sum(lin * mask_f, axis=-1, keepdims=True)
    q_f = jnp.sum(lin_sq * mask_f, axis=-1, keepdims=True)
    inv_e2 = 1.0 / E2
    mu2 = jnp.where(is_f, s_f, s_all - s_f) * inv_e2
    msq2 = jnp.where(is_f, q_f, q_all - q_f) * inv_e2
    merged = (lin - mu2) * jax.lax.rsqrt(msq2 - mu2 * mu2 + LN_EPS)  # [fe | pe]

    # ---- single output projection (f32; K=N=E is tiny, no bf16 casts) ----
    out_ref[...] = (
        jnp.dot(merged, wo_ref[...], preferred_element_type=jnp.float32) + bo_ref[...]
    )


def make_freq_matrix(C, P):
    """Real matrix M s.t. x_patch_flat @ M == flattened view_as_real(fft2(patch)),
    with output feature ordering (p1, p2, ri, c) as in the einops Rearrange."""
    patch_dim = C * P * P

    def feat(xflat):
        xp = xflat.reshape(C, P, P)
        f = jnp.fft.fft2(xp)                                   # (C, P, P) complex
        fr = jnp.stack([jnp.real(f), jnp.imag(f)], axis=-1)    # (C, P, P, 2)
        return jnp.transpose(fr, (1, 2, 3, 0)).reshape(-1)     # (p1 p2 ri c)

    eye = jnp.eye(patch_dim, dtype=jnp.float32)
    # fft2 is linear, so feat(x) = x @ M with M rows = feat(basis vectors).
    return jax.vmap(feat)(eye).astype(jnp.float32)             # (patch_dim, freq_dim)


def init_params(key, C, P, E):
    """Deterministic synthetic parameters.  NOTE: Linear weights are stored
    (in_features, out_features), i.e. already transposed vs. torch.nn.Linear."""
    patch_dim = C * P * P
    freq_dim = 2 * patch_dim
    E2 = E // 2
    ks = jax.random.split(key, 14)

    def rnd(k, shape, scale=0.1):
        return scale * jax.random.normal(k, shape, dtype=jnp.float32)

    g1 = 1.0 + rnd(ks[0], (1, patch_dim));  b1 = rnd(ks[1], (1, patch_dim))
    wp = rnd(ks[2], (patch_dim, E2), scale=patch_dim ** -0.5)
    bp = rnd(ks[3], (1, E2))
    g2 = 1.0 + rnd(ks[4], (1, E2));         b2 = rnd(ks[5], (1, E2))
    gf1 = 1.0 + rnd(ks[6], (1, freq_dim));  bf1 = rnd(ks[7], (1, freq_dim))
    wf = rnd(ks[8], (freq_dim, E2), scale=freq_dim ** -0.5)
    bf = rnd(ks[9], (1, E2))
    gf2 = 1.0 + rnd(ks[10], (1, E2));       bf2 = rnd(ks[11], (1, E2))
    wo = rnd(ks[12], (E, E), scale=E ** -0.5)
    bo = rnd(ks[13], (1, E))
    return (g1, b1, wp, bp, g2, b2, gf1, bf1, wf, bf, gf2, bf2, wo, bo)


def fft_patch_embed_v2(x, params, M, *, patch_size, embed_dim, token_tile=2048):
    B, C, H, W = x.shape
    P = patch_size
    h, w = H // P, W // P
    N = h * w
    total = B * N
    patch_dim = C * P * P
    E = embed_dim
    E2 = E // 2

    (g1, b1, wp, bp, g2, b2, gf1, bf1, wf, bf, gf2, bf2, wo, bo) = params

    # ---- fold LayerNorm affine params into adjacent Linears (exact, f32, once) ----
    # LN1(x)@wp + bp   == norm(x)  @ (diag(g1)  wp) + (b1  @ wp + bp)
    # LN(ff)@wf + bf   == norm(ff) @ (diag(gf1) wf) + (bf1 @ wf + bf)
    # [LN2f, LN2p]@wo + bo == norm(fe_lin)@(diag(gf2) wo_f) + norm(pe_lin)@(diag(g2) wo_p)
    #                         + (bf2@wo_f + b2@wo_p + bo)
    wp_fold = wp * g1.reshape(-1, 1)                 # (patch_dim, E2)
    bp_fold = bp + b1 @ wp                           # (1, E2)
    wf_fold = wf * gf1.reshape(-1, 1)                # (freq_dim, E2)
    bf_fold = bf + bf1 @ wf                          # (1, E2)
    wo_f = wo[:E2, :] * gf2.reshape(-1, 1)           # (E2, E)
    wo_p = wo[E2:, :] * g2.reshape(-1, 1)            # (E2, E)
    bo_fold = bo + bf2 @ wo[:E2, :] + b2 @ wo[E2:, :]  # (1, E)

    # ---- fuse the freq-branch Linear through the DFT map; pack both branches ----
    mwf = M @ wf_fold                                # (patch_dim, E2), f32
    w_br = jnp.concatenate([mwf, wp_fold], axis=1)   # (patch_dim, E): [freq | patch]
    cs = jnp.concatenate([jnp.sum(wf_fold, axis=0, keepdims=True),
                          jnp.sum(wp_fold, axis=0, keepdims=True)], axis=1)  # (1, E)
    bb = jnp.concatenate([bf_fold, bp_fold], axis=1)            # (1, E)
    wo_stack = jnp.concatenate([wo_f, wo_p], axis=0)            # (E, E), f32

    m_bf = M.astype(jnp.bfloat16)
    w_br_bf = w_br.astype(jnp.bfloat16)

    # Rearrange 'b c (h p1) (w p2) -> (b h w) (c p1 p2)'  (glue) + bf16 tokens.
    # (Kept wrapper-side; for very large inputs this is one extra HBM pass of x.)
    tok = (x.reshape(B, C, h, P, w, P)
            .transpose(0, 2, 4, 1, 3, 5)
            .reshape(total, patch_dim)).astype(jnp.bfloat16)

    # ---- token tile sizing ----
    # No >=8-step cap: v5e/v6e have a single TC, so extra grid steps only add
    # ~0.35us/step overhead.  VMEM is a non-issue (2048-token tile ~2 MiB).
    # If the grid splits at all, prefer an even step count (v7x megacore balance).
    T = min(_round_up(max(token_tile, 16), 16), _round_up(total, 16))
    steps = -(-total // T)
    if steps > 1 and steps % 2 == 1:
        steps += 1
        T = _round_up(-(-total // steps), 16)
    padded = _round_up(total, T)
    if padded != total:
        # Zero-pad the tail tile; padded rows produce finite garbage sliced off below.
        tok = jnp.pad(tok, ((0, padded - total), (0, 0)))
    grid = (padded // T,)

    tok_map = lambda i: (i, 0)
    full = lambda a: pl.BlockSpec(a.shape, lambda i: (0, 0))

    out_flat = pl.pallas_call(
        fft_patch_embed_kernel,
        out_shape=jax.ShapeDtypeStruct((padded, E), jnp.float32),
        grid_spec=pltpu.PrefetchScalarGridSpec(
            num_scalar_prefetch=0,
            grid=grid,
            in_specs=[
                pl.BlockSpec((T, patch_dim), tok_map),
                full(m_bf), full(w_br_bf), full(cs), full(bb),
                full(wo_stack), full(bo_fold),
            ],
            out_specs=pl.BlockSpec((T, E), tok_map),
        ),
        compiler_params=pltpu.CompilerParams(dimension_semantics=("parallel",)),
    )(tok, m_bf, w_br_bf, cs, bb, wo_stack, bo_fold)

    # Rearrange 'b (h w) d -> b d h w'
    out = out_flat[:total]
    return out.reshape(B, N, E).transpose(0, 2, 1).reshape(B, E, h, w)


def reference(x, params, *, patch_size, embed_dim):
    """Pure-JAX f32 reference matching the PyTorch forward semantics."""
    (g1, b1, wp, bp, g2, b2, gf1, bf1, wf, bf, gf2, bf2, wo, bo) = params
    B, C, H, W = x.shape
    P = patch_size
    h, w = H // P, W // P
    N = h * w
    patch_dim = C * P * P
    freq_dim = 2 * patch_dim
    E = embed_dim

    def ln(v, g, b):
        mu = jnp.mean(v, axis=-1, keepdims=True)
        var = jnp.mean((v - mu) ** 2, axis=-1, keepdims=True)
        return (v - mu) / jnp.sqrt(var + LN_EPS) * g + b

    tok = (x.reshape(B, C, h, P, w, P)
            .transpose(0, 2, 4, 1, 3, 5)
            .reshape(B * N, patch_dim)).astype(jnp.float32)

    pe = ln(ln(tok, g1, b1) @ wp + bp, g2, b2)

    xp = tok.reshape(B * N, C, P, P)
    f = jnp.fft.fft2(xp)
    fr = jnp.stack([jnp.real(f), jnp.imag(f)], axis=-1)       # (BN, C, P, P, 2)
    ff = jnp.transpose(fr, (0, 2, 3, 4, 1)).reshape(B * N, freq_dim)
    fe = ln(ln(ff, gf1, bf1) @ wf + bf, gf2, bf2)

    merged = jnp.concatenate([fe, pe], axis=-1)
    out = merged @ wo + bo
    return out.reshape(B, N, E).transpose(0, 2, 1).reshape(B, E, h, w)


if __name__ == "__main__":
    # Small shapes consistent with the module: img 16x16, patch 4, 3 channels.
    B, C, H, W = 2, 3, 16, 16
    P, E = 4, 32

    key = jax.random.PRNGKey(0)
    kx, kp = jax.random.split(key)
    x = jax.random.normal(kx, (B, C, H, W), dtype=jnp.float32)
    params = init_params(kp, C, P, E)
    M = make_freq_matrix(C, P)

    out = fft_patch_embed_v2(x, params, M, patch_size=P, embed_dim=E)
    out = jax.block_until_ready(out)

    assert out.shape == (B, E, H // P, W // P), out.shape
    ref = reference(x, params, patch_size=P, embed_dim=E)
    # Tolerance sized for bf16 matmul operands with f32 accumulation.
    np.testing.assert_allclose(np.asarray(out), np.asarray(ref), atol=3e-2, rtol=3e-2)

    print("KERNEL_OK")
</pallas_src>

<mosaic_0001>
module attributes {stable_mosaic.version = 11 : i64} {
  func.func @fft_patch_embed_kernel(%arg0: i32, %arg1: memref<32x48xbf16, #tpu.memory_space<vmem>>, %arg2: memref<48x96xbf16, #tpu.memory_space<vmem>>, %arg3: memref<48x32xbf16, #tpu.memory_space<vmem>>, %arg4: memref<1x32xf32, #tpu.memory_space<vmem>>, %arg5: memref<1x32xf32, #tpu.memory_space<vmem>>, %arg6: memref<32x32xf32, #tpu.memory_space<vmem>>, %arg7: memref<1x32xf32, #tpu.memory_space<vmem>>, %arg8: memref<32x32xf32, #tpu.memory_space<vmem>>) attributes {dimension_semantics = [#tpu.dimension_semantics<parallel>], iteration_bounds = array<i64: 1>, scalar_prefetch = 0 : i64, scratch_operands = 0 : i64, tpu.core_type = #tpu.core_type<tc>, window_params = [{transform_indices = @transform_0, window_bounds = array<i64: 32, 48>}, {pipeline_mode = #tpu.pipeline_mode<synchronous>, transform_indices = @transform_1, window_bounds = array<i64: 48, 96>}, {pipeline_mode = #tpu.pipeline_mode<synchronous>, transform_indices = @transform_2, window_bounds = array<i64: 48, 32>}, {pipeline_mode = #tpu.pipeline_mode<synchronous>, transform_indices = @transform_3, window_bounds = array<i64: 1, 32>}, {pipeline_mode = #tpu.pipeline_mode<synchronous>, transform_indices = @transform_4, window_bounds = array<i64: 1, 32>}, {pipeline_mode = #tpu.pipeline_mode<synchronous>, transform_indices = @transform_5, window_bounds = array<i64: 32, 32>}, {pipeline_mode = #tpu.pipeline_mode<synchronous>, transform_indices = @transform_6, window_bounds = array<i64: 1, 32>}, {transform_indices = @transform_7, window_bounds = array<i64: 32, 32>}]} {
    %c0 = arith.constant 0 : index
    %c0_0 = arith.constant 0 : index
    %0 = vector.load %arg1[%c0, %c0_0] : memref<32x48xbf16, #tpu.memory_space<vmem>>, vector<32x48xbf16>
    %c0_1 = arith.constant 0 : index
    %c0_2 = arith.constant 0 : index
    %1 = vector.load %arg2[%c0_1, %c0_2] : memref<48x96xbf16, #tpu.memory_space<vmem>>, vector<48x96xbf16>
    %cst = arith.constant dense<0.000000e+00> : vector<32x96xf32>
    %2 = tpu.matmul %0, %1, %cst {dimension_numbers = #tpu.dot_dimension_numbers<[1], [0], [0], [1], [0, 0, 1, 1], [], []>} : vector<32x48xbf16>, vector<48x96xbf16>, vector<32x96xf32> -> vector<32x96xf32>
    %c0_3 = arith.constant 0 : index
    %c0_4 = arith.constant 0 : index
    %3 = vector.load %arg3[%c0_3, %c0_4] : memref<48x32xbf16, #tpu.memory_space<vmem>>, vector<48x32xbf16>
    %cst_5 = arith.constant dense<0.000000e+00> : vector<32x32xf32>
    %4 = tpu.matmul %0, %3, %cst_5 {dimension_numbers = #tpu.dot_dimension_numbers<[1], [0], [0], [1], [0, 0, 1, 1], [], []>} : vector<32x48xbf16>, vector<48x32xbf16>, vector<32x32xf32> -> vector<32x32xf32>
    %5 = arith.extf %0 : vector<32x48xbf16> to vector<32x48xf32>
    %cst_6 = arith.constant dense<0.000000e+00> : vector<32xf32>
    %6 = vector.multi_reduction <add>, %5, %cst_6 [1] : vector<32x48xf32> to vector<32xf32>
    %7 = vector.shape_cast %6 : vector<32xf32> to vector<32x1xf32>
    %cst_7 = arith.constant 4.800000e+01 : f32
    %8 = vector.broadcast %cst_7 : f32 to vector<32x1xf32>
    %9 = arith.divf %7, %8 : vector<32x1xf32>
    %10 = arith.mulf %5, %5 : vector<32x48xf32>
    %cst_8 = arith.constant dense<0.000000e+00> : vector<32xf32>
    %11 = vector.multi_reduction <add>, %10, %cst_8 [1] : vector<32x48xf32> to vector<32xf32>
    %12 = vector.shape_cast %11 : vector<32xf32> to vector<32x1xf32>
    %cst_9 = arith.constant 4.800000e+01 : f32
    %13 = vector.broadcast %cst_9 : f32 to vector<32x1xf32>
    %14 = arith.divf %12, %13 : vector<32x1xf32>
    %15 = arith.mulf %9, %9 : vector<32x1xf32>
    %16 = arith.subf %14, %15 : vector<32x1xf32>
    %cst_10 = arith.constant 9.99999974E-6 : f32
    %17 = vector.broadcast %cst_10 : f32 to vector<32x1xf32>
    %18 = arith.addf %16, %17 : vector<32x1xf32>
    %19 = math.rsqrt %18 : vector<32x1xf32>
    %cst_11 = arith.constant dense<0.000000e+00> : vector<32xf32>
    %20 = vector.multi_reduction <add>, %2, %cst_11 [1] : vector<32x96xf32> to vector<32xf32>
    %21 = vector.shape_cast %20 : vector<32xf32> to vector<32x1xf32>
    %cst_12 = arith.constant 9.600000e+01 : f32
    %22 = vector.broadcast %cst_12 : f32 to vector<32x1xf32>
    %23 = arith.divf %21, %22 : vector<32x1xf32>
    %24 = arith.mulf %2, %2 : vector<32x96xf32>
    %cst_13 = arith.constant dense<0.000000e+00> : vector<32xf32>
    %25 = vector.multi_reduction <add>, %24, %cst_13 [1] : vector<32x96xf32> to vector<32xf32>
    %26 = vector.shape_cast %25 : vector<32xf32> to vector<32x1xf32>
    %cst_14 = arith.constant 9.600000e+01 : f32
    %27 = vector.broadcast %cst_14 : f32 to vector<32x1xf32>
    %28 = arith.divf %26, %27 : vector<32x1xf32>
    %29 = arith.mulf %23, %23 : vector<32x1xf32>
    %30 = arith.subf %28, %29 : vector<32x1xf32>
    %cst_15 = arith.constant 9.99999974E-6 : f32
    %31 = vector.broadcast %cst_15 : f32 to vector<32x1xf32>
    %32 = arith.addf %30, %31 : vector<32x1xf32>
    %33 = math.rsqrt %32 : vector<32x1xf32>
    %34 = tpu.iota {dimensions = array<i32: 1>} : vector<32x32xi32>
    %c16_i32 = arith.constant 16 : i32
    %35 = vector.broadcast %c16_i32 : i32 to vector<32x32xi32>
    %36 = arith.cmpi slt, %34, %35 : vector<32x32xi32>
    %37 = vector.shape_cast %23 : vector<32x1xf32> to vector<32x1xf32>
    %38 = vector.broadcast %37 : vector<32x1xf32> to vector<32x32xf32>
    %39 = vector.shape_cast %9 : vector<32x1xf32> to vector<32x1xf32>
    %40 = vector.broadcast %39 : vector<32x1xf32> to vector<32x32xf32>
    %41 = arith.select %36, %38, %40 : vector<32x32xi1>, vector<32x32xf32>
    %42 = vector.shape_cast %33 : vector<32x1xf32> to vector<32x1xf32>
    %43 = vector.broadcast %42 : vector<32x1xf32> to vector<32x32xf32>
    %44 = vector.shape_cast %19 : vector<32x1xf32> to vector<32x1xf32>
    %45 = vector.broadcast %44 : vector<32x1xf32> to vector<32x32xf32>
    %46 = arith.select %36, %43, %45 : vector<32x32xi1>, vector<32x32xf32>
    %c0_16 = arith.constant 0 : index
    %c0_17 = arith.constant 0 : index
    %47 = vector.load %arg4[%c0_16, %c0_17] : memref<1x32xf32, #tpu.memory_space<vmem>>, vector<1x32xf32>
    %48 = vector.broadcast %47 : vector<1x32xf32> to vector<32x32xf32>
    %49 = arith.mulf %41, %48 : vector<32x32xf32>
    %50 = arith.subf %4, %49 : vector<32x32xf32>
    %51 = arith.mulf %50, %46 : vector<32x32xf32>
    %c0_18 = arith.constant 0 : index
    %c0_19 = arith.constant 0 : index
    %52 = vector.load %arg5[%c0_18, %c0_19] : memref<1x32xf32, #tpu.memory_space<vmem>>, vector<1x32xf32>
    %53 = vector.broadcast %52 : vector<1x32xf32> to vector<32x32xf32>
    %54 = arith.addf %51, %53 : vector<32x32xf32>
    %55 = arith.extui %36 : vector<32x32xi1> to vector<32x32xi32>
    %56 = arith.sitofp %55 : vector<32x32xi32> to vector<32x32xf32>
    %57 = arith.mulf %54, %54 : vector<32x32xf32>
    %cst_20 = arith.constant dense<0.000000e+00> : vector<32xf32>
    %58 = vector.multi_reduction <add>, %54, %cst_20 [1] : vector<32x32xf32> to vector<32xf32>
    %59 = vector.shape_cast %58 : vector<32xf32> to vector<32x1xf32>
    %cst_21 = arith.constant dense<0.000000e+00> : vector<32xf32>
    %60 = vector.multi_reduction <add>, %57, %cst_21 [1] : vector<32x32xf32> to vector<32xf32>
    %61 = vector.shape_cast %60 : vector<32xf32> to vector<32x1xf32>
    %62 = arith.mulf %54, %56 : vector<32x32xf32>
    %cst_22 = arith.constant dense<0.000000e+00> : vector<32xf32>
    %63 = vector.multi_reduction <add>, %62, %cst_22 [1] : vector<32x32xf32> to vector<32xf32>
    %64 = vector.shape_cast %63 : vector<32xf32> to vector<32x1xf32>
    %65 = arith.mulf %57, %56 : vector<32x32xf32>
    %cst_23 = arith.constant dense<0.000000e+00> : vector<32xf32>
    %66 = vector.multi_reduction <add>, %65, %cst_23 [1] : vector<32x32xf32> to vector<32xf32>
    %67 = vector.shape_cast %66 : vector<32xf32> to vector<32x1xf32>
    %68 = arith.subf %59, %64 : vector<32x1xf32>
    %69 = vector.shape_cast %64 : vector<32x1xf32> to vector<32x1xf32>
    %70 = vector.broadcast %69 : vector<32x1xf32> to vector<32x32xf32>
    %71 = vector.shape_cast %68 : vector<32x1xf32> to vector<32x1xf32>
    %72 = vector.broadcast %71 : vector<32x1xf32> to vector<32x32xf32>
    %73 = arith.select %36, %70, %72 : vector<32x32xi1>, vector<32x32xf32>
    %cst_24 = arith.constant 6.250000e-02 : f32
    %74 = vector.broadcast %cst_24 : f32 to vector<32x32xf32>
    %75 = arith.mulf %73, %74 : vector<32x32xf32>
    %76 = arith.subf %61, %67 : vector<32x1xf32>
    %77 = vector.shape_cast %67 : vector<32x1xf32> to vector<32x1xf32>
    %78 = vector.broadcast %77 : vector<32x1xf32> to vector<32x32xf32>
    %79 = vector.shape_cast %76 : vector<32x1xf32> to vector<32x1xf32>
    %80 = vector.broadcast %79 : vector<32x1xf32> to vector<32x32xf32>
    %81 = arith.select %36, %78, %80 : vector<32x32xi1>, vector<32x32xf32>
    %cst_25 = arith.constant 6.250000e-02 : f32
    %82 = vector.broadcast %cst_25 : f32 to vector<32x32xf32>
    %83 = arith.mulf %81, %82 : vector<32x32xf32>
    %84 = arith.subf %54, %75 : vector<32x32xf32>
    %85 = arith.mulf %75, %75 : vector<32x32xf32>
    %86 = arith.subf %83, %85 : vector<32x32xf32>
    %cst_26 = arith.constant 9.99999974E-6 : f32
    %87 = vector.broadcast %cst_26 : f32 to vector<32x32xf32>
    %88 = arith.addf %86, %87 : vector<32x32xf32>
    %89 = math.rsqrt %88 : vector<32x32xf32>
    %90 = arith.mulf %84, %89 : vector<32x32xf32>
    %c0_27 = arith.constant 0 : index
    %c0_28 = arith.constant 0 : index
    %91 = vector.load %arg6[%c0_27, %c0_28] : memref<32x32xf32, #tpu.memory_space<vmem>>, vector<32x32xf32>
    %cst_29 = arith.constant dense<0.000000e+00> : vector<32x32xf32>
    %92 = tpu.matmul %90, %91, %cst_29 {dimension_numbers = #tpu.dot_dimension_numbers<[1], [0], [0], [1], [0, 0, 1, 1], [], []>} : vector<32x32xf32>, vector<32x32xf32>, vector<32x32xf32> -> vector<32x32xf32>
    %c0_30 = arith.constant 0 : index
    %c0_31 = arith.constant 0 : index
    %93 = vector.load %arg7[%c0_30, %c0_31] : memref<1x32xf32, #tpu.memory_space<vmem>>, vector<1x32xf32>
    %94 = vector.broadcast %93 : vector<1x32xf32> to vector<32x32xf32>
    %95 = arith.addf %92, %94 : vector<32x32xf32>
    %c0_32 = arith.constant 0 : index
    %c0_33 = arith.constant 0 : index
    %96 = vector.load %arg8[%c0_32, %c0_33] : memref<32x32xf32, #tpu.memory_space<vmem>>, vector<32x32xf32>
    tpu.vector_store %arg8[%c0_32, %c0_33], %95 {strides = array<i32>} : memref<32x32xf32, #tpu.memory_space<vmem>>, vector<32x32xf32>,
    return
  }
  func.func @transform_0(%arg0: i32) -> (i32, i32) {
    %c0_i32 = arith.constant 0 : i32
    %c0_i32_0 = arith.constant 0 : i32
    return %arg0, %c0_i32 : i32, i32
  }
  func.func @transform_1(%arg0: i32) -> (i32, i32) {
    %c0_i32 = arith.constant 0 : i32
    %c0_i32_0 = arith.constant 0 : i32
    %c0_i32_1 = arith.constant 0 : i32
    return %c0_i32, %c0_i32_0 : i32, i32
  }
  func.func @transform_2(%arg0: i32) -> (i32, i32) {
    %c0_i32 = arith.constant 0 : i32
    %c0_i32_0 = arith.constant 0 : i32
    %c0_i32_1 = arith.constant 0 : i32
    return %c0_i32, %c0_i32_0 : i32, i32
  }
  func.func @transform_3(%arg0: i32) -> (i32, i32) {
    %c0_i32 = arith.constant 0 : i32
    %c0_i32_0 = arith.constant 0 : i32
    %c0_i32_1 = arith.constant 0 : i32
    return %c0_i32, %c0_i32_0 : i32, i32
  }
  func.func @transform_4(%arg0: i32) -> (i32, i32) {
    %c0_i32 = arith.constant 0 : i32
    %c0_i32_0 = arith.constant 0 : i32
    %c0_i32_1 = arith.constant 0 : i32
    return %c0_i32, %c0_i32_0 : i32, i32
  }
  func.func @transform_5(%arg0: i32) -> (i32, i32) {
    %c0_i32 = arith.constant 0 : i32
    %c0_i32_0 = arith.constant 0 : i32
    %c0_i32_1 = arith.constant 0 : i32
    return %c0_i32, %c0_i32_0 : i32, i32
  }
  func.func @transform_6(%arg0: i32) -> (i32, i32) {
    %c0_i32 = arith.constant 0 : i32
    %c0_i32_0 = arith.constant 0 : i32
    %c0_i32_1 = arith.constant 0 : i32
    return %c0_i32, %c0_i32_0 : i32, i32
  }
  func.func @transform_7(%arg0: i32) -> (i32, i32) {
    %c0_i32 = arith.constant 0 : i32
    %c0_i32_0 = arith.constant 0 : i32
    return %arg0, %c0_i32 : i32, i32
  }
}

</mosaic_0001>

<bundles_post_ra>
// kernel: tpu_custom_call.1
= control target key start
LH: loop header
LB: loop body
LE: loop exit
PB: predicated region body
PF: predicated region fallthrough
CT: control target
= control target key end

     0   :  { %12 = vsyncpa [#allocation3], 0  ;;  %s1011_s0 = inlined_call_operand.vmem [shape: bf16[32,48], index: 0, kind: input, shape index: {}]   ;;  %s1012_s1 = inlined_call_operand.hbm [shape: bf16[48,96], index: 1, kind: input, shape index: {}]   ;;  %s1013_s2 = inlined_call_operand.vmem [shape: bf16[48,32], index: 2, kind: input, shape index: {}]   ;;  %s1014_s3 = inlined_call_operand.vmem [shape: f32[1,32], index: 3, kind: input, shape index: {}]   ;;  %s1015_s4 = inlined_call_operand.hbm [shape: f32[1,32], index: 4, kind: input, shape index: {}]   ;;  %s1016_s5 = inlined_call_operand.vmem [shape: f32[32,32], index: 5, kind: input, shape index: {}]   ;;  %s1017_s6 = inlined_call_operand.vmem [shape: f32[1,32], index: 6, kind: input, shape index: {}]   ;;  %s1018_s7 = inlined_call_operand.hbm [shape: f32[32,32], index: 7, kind: output, shape index: {}]  }
   0x1   :  { %13 = vsyncpa [#allocation6], 0 }
   0x2   :  { %14 = vsyncpa [#allocation4], 0  ;;  %s802_s24 = smov [#allocation2]  }
   0x3   :  { %s22_s25 = sshll.u32 %s802_s24, 4  ;;  %s23_s25 = int_to_ptr.vmem [resolvable:$true] %s22_s25 }
   0x4   :  { %s744_s26 = scalar_lea.vmem %s23_s25, 384  ;;  %p749_p1 = scmp.lt.s32.totalorder %s23_s25, %s23_s25 }
   0x5   :  { %p745_p0 = scmp.ne.s32.totalorder %s23_s25, %s744_s26  ;;  %p750_p2 = scmp.lt.s32.totalorder %s744_s26, %s744_s26 }
   0x7   :  { %p751_p3 = por %p750_p2, %p749_p1 }
   0x9   :  { %p752_p4 = pnand %p751_p3, %p745_p0 }
   0xb   :  { %755 = shalt.err (!%p752_p4)
}
   0xc   :  { %s803_s27 = smov 64   ;;  %s804_s28 = smov 4  }
   0xd   :  { %28 = dma.hbm_to_vmem [thread:$0]  %s1012_s1, 384, %s23_s25, [#allocation3], %s803_s27, %s803_s27, %s804_s28  }
   0xe   :  { %s805_s8 = smov [#allocation5]  }
   0xf   :  { %s39_s9 = sshll.u32 %s805_s8, 4  ;;  %s40_s9 = int_to_ptr.vmem [resolvable:$true] %s39_s9 }
  0x10   :  { %s764_s10 = scalar_lea.vmem %s40_s9, 16  ;;  %s768_s11 = scalar_lea.vmem %s40_s9, 32 }
  0x11   :  { %p765_p5 = scmp.ne.s32.totalorder %s40_s9, %s764_s10  ;;  %p769_p6 = scmp.lt.s32.totalorder %s40_s9, %s40_s9 }
  0x12   :  { %p770_p7 = scmp.lt.s32.totalorder %s768_s11, %s764_s10 }
  0x14   :  { %p771_p8 = por %p770_p7, %p769_p6 }
  0x16   :  { %p772_p9 = pnand %p771_p8, %p765_p5 }
  0x18   :  { %775 = shalt.err (!%p772_p9)
}
  0x19   :  { %42 = dma.hbm_to_vmem [thread:$0]  %s1015_s4, 16, %s40_s9, [#allocation6]  }
  0x1a   :  { %796 = dma.done.wait [#allocation3], 384  }
  0x1b   :  { %797 = vsyncadd [#allocation3], 4294966912 }
  0x1c   :  { %798 = dma.done.wait [#allocation6], 16  }
  0x1d   :  { %799 = vsyncadd [#allocation6], 4294967280  ;;  %v702_v0 = vld [vmem:[#allocation2 + $0x10] sm:$0xff]   ;;  %v703_v1 = vld [vmem:[#allocation2 + $0x8] sm:$0xff]   ;;  %vm92_vm0 = vcmask 392192   ;;  %vm278_vm1 = vcmask 785408  }
  0x1e   :  { %652 = vmatprep.subr.bf16.mxu0 %v702_v0  ;;  %v704_v2 = vld [vmem:[#allocation2] sm:$0xff]   ;;  %v56_v4 = vld [vmem:[%s1011_s0 + $0x8] sm:$0xff]   ;;  %v707_v5 = vld [vmem:[%s1013_s2 + $0x10] sm:$0xff]   ;;  %vm379_vm3 = vcmask 261120   ;;  %s807_s30 = smov [#allocation7]  }
  0x1f   :  { %653 = vmatpush3.bf16.msra.mxu0 %v702_v0  ;;  %v54_v3 = vld [vmem:[%s1011_s0] sm:$0xff]   ;;  %v224_v7 = vunpack.c.h.bf16 %v56_v4  ;;  %v708_v8 = vld [vmem:[%s1013_s2 + $0x8] sm:$0xff]   ;;  %v223_v9 = vunpack.c.l.bf16 %v56_v4  ;;  %662 = vmatprep.subr.bf16.mxu1 %v707_v5  ;;  %s601_s8 = sshll.u32 %s807_s30, 4  ;;  %s602_s8 = int_to_ptr.vmem [resolvable:$true] %s601_s8 }
  0x20   :  { %654 = vmatprep.subr.bf16.mxu0 %v703_v1  ;;  %v221_v6 = vunpack.c.l.bf16 %v54_v3  ;;  %658 = vmatprep.mubr.msk.bf16.mxu0 %vm92_vm0, %v54_v3  ;;  %v709_v13 = vld [vmem:[%s1013_s2] sm:$0xff]   ;;  %v222_v15 = vunpack.c.h.bf16 %v54_v3  ;;  %p781_p11 = scmp.lt.s32.totalorder %s602_s8, %s602_s8 }
  0x21   :  { %663 = vmatpush3.bf16.msra.mxu1 %v707_v5  ;;  %v234_v11 = vsel %vm92_vm0, %v224_v7, 0.0  ;;  %v244_v12 = vmul.f32 %v223_v9, %v223_v9  ;;  %668 = vmatprep.mubr.msk.bf16.mxu1 %vm92_vm0, %v54_v3  ;;  %v231_v14 = vsel %vm92_vm0, %v223_v9, 0.0  ;;  %v245_v17 = vmul.f32 %v224_v7, %v224_v7 }
  0x22   :  { %v225_v10 = vsel %vm92_vm0, %v221_v6, 0.0  ;;  %664 = vmatprep.subr.bf16.mxu1 %v708_v8  ;;  %235 = vadd.xlane.f32.xlu1 %v234_v11  ;;  %v228_v18 = vsel %vm92_vm0, %v222_v15, 0.0  ;;  %v242_v19 = vmul.f32 %v221_v6, %v221_v6  ;;  %v243_v22 = vmul.f32 %v222_v15, %v222_v15 }
  0x23   :  { %655 = vmatpush3.bf16.msra.mxu0 %v703_v1  ;;  %226 = vadd.xlane.f32.xlu0 %v225_v10  ;;  %v252_v16 = vsel %vm92_vm0, %v244_v12, 0.0  ;;  %v255_v20 = vsel %vm92_vm0, %v245_v17, 0.0 }
  0x24   :  { %656 = vmatprep.subr.bf16.mxu0 %v704_v2  ;;  %v246_v21 = vsel %vm92_vm0, %v242_v19, 0.0  ;;  %v249_v23 = vsel %vm92_vm0, %v243_v22, 0.0 }
  0x25   :  { %665 = vmatpush3.bf16.msra.mxu1 %v708_v8 }
  0x26   :  { %666 = vmatprep.subr.bf16.mxu1 %v709_v13  ;;  %253 = vadd.xlane.f32.xlu1 %v252_v16 }
  0x27   :  { %657 = vmatpush3.bf16.msra.mxu0 %v704_v2  ;;  %232 = vadd.xlane.f32.xlu0 %v231_v14  ;;  %v332_v14 = vlaneseq }
  0x29   :  { %667 = vmatpush3.bf16.msra.mxu1 %v709_v13 }
  0x2a   :  { %659 = vmatmul.mubr.msk.bf16.vlgmr.msra.gmra.mxu0 %vm92_vm0, %v56_v4  ;;  %256 = vadd.xlane.f32.xlu1 %v255_v20 }
  0x2b   :  { %229 = vadd.xlane.f32.xlu0 %v228_v18 }
  0x2c   :  { %669 = vmatmul.mubr.msk.bf16.vlgmr.msra.gmra.mxu1 %vm92_vm0, %v56_v4 }
  0x2f   :  { %247 = vadd.xlane.f32.xlu0 %v246_v21 }
  0x33   :  { %250 = vadd.xlane.f32.xlu0 %v249_v23 }
  0xab   :  { %v236_v41 = vpop.xlane.xlu1 %235 }
  0xac   :  { %v227_v40 = vpop.xlane.xlu0 %226  ;;  %v893_v56 = vmul.f32 0.020833334, %v236_v41 }
  0xad   :  { %v238_v45 = vmul.f32 0.020833334, %v227_v40 }
  0xae   :  { %v265_v3 = vmul.f32 %v893_v56, %v893_v56 }
  0xaf   :  { %v254_v43 = vpop.xlane.xlu1 %253  ;;  %v262_v49 = vmul.f32 %v238_v45, %v238_v45 }
  0xb0   :  { %v233_v42 = vpop.xlane.xlu0 %232  ;;  %v260_v54 = vmul.f32 0.020833334, %v254_v43 }
  0xb1   :  { %v240_v48 = vmul.f32 0.020833334, %v233_v42 }
  0xb3   :  { %v257_v46 = vpop.xlane.xlu1 %256  ;;  %v264_v53 = vmul.f32 %v240_v48, %v240_v48 }
  0xb4   :  { %v230_v44 = vpop.xlane.xlu0 %229  ;;  %v261_v12 = vmul.f32 0.020833334, %v257_v46  ;;  %v627_v46 = vld [vmem:[#allocation5] ss:$0 sm:$0xff] }
  0xb5   :  { %v891_v55 = vmul.f32 0.020833334, %v230_v44  ;;  %v268_v62 = vsub.f32 %v260_v54, %v264_v53  ;;  %v806_v54 = vmov 0.0  }
  0xb6   :  { %v269_v23 = vsub.f32 %v261_v12, %v265_v3 }
  0xb7   :  { %v263_v63 = vmul.f32 %v891_v55, %v891_v55  ;;  %v272_v11 = vadd.f32 1e-05, %v268_v62 }
  0xb8   :  { %v248_v47 = vpop.xlane.xlu0 %247 }
  0xb9   :  { %v258_v50 = vmul.f32 0.020833334, %v248_v47 }
  0xbb   :  { %v266_v57 = vsub.f32 %v258_v50, %v262_v49 }
  0xbc   :  { %v251_v51 = vpop.xlane.xlu0 %250 }
  0xbd   :  { %v259_v0 = vmul.f32 0.020833334, %v251_v51  ;;  %v270_v4 = vadd.f32 1e-05, %v266_v57 }
  0xbf   :  { %v267_v13 = vsub.f32 %v259_v0, %v263_v63  ;;  %712 = vrsqrt.f32 %v270_v4 }
  0xcc   :  { %v713_v41 = vpop.eup %712 }
  0xea   :  { %v660_v24 = vpop.f32.mrf.mxu0 }
  0xeb   :  { %v285_v25 = vsel %vm278_vm1, %v660_v24, 0.0  ;;  %v298_v29 = vmul.f32 %v660_v24, %v660_v24  ;;  %v271_v24 = vadd.f32 1e-05, %v267_v13 }
  0xec   :  { %286 = vadd.xlane.f32.xlu1 %v285_v25  ;;  %v133_v26 = vpop.f32.mrf.mxu0  ;;  %v899_v25 = vand.u32 127, %v332_v14 }
  0xed   :  { %v296_v27 = vmul.f32 %v133_v26, %v133_v26  ;;  %v279_v31 = vsel %vm278_vm1, %v133_v26, 0.0  ;;  %v306_v34 = vsel %vm278_vm1, %v298_v29, 0.0 }
  0xee   :  { %v661_v28 = vpop.f32.mrf.mxu0  ;;  %vm334_vm2 = vcmp.lt.s32.totalorder %v899_v25, 16 }
  0xef   :  { %v300_v30 = vsel %vm278_vm1, %v296_v27, 0.0  ;;  %v299_v36 = vmul.f32 %v661_v28, %v661_v28  ;;  %v288_v37 = vsel %vm278_vm1, %v661_v28, 0.0  ;;  %v628_v57 = vsel %vm334_vm2, 1.0, %v806_v54 }
  0xf0   :  { %301 = vadd.xlane.f32.xlu0 %v300_v30  ;;  %280 = vadd.xlane.f32.xlu1 %v279_v31  ;;  %v136_v32 = vpop.f32.mrf.mxu0  ;;  %v273_v31 = vadd.f32 1e-05, %v269_v23 }
  0xf1   :  { %v297_v33 = vmul.f32 %v136_v32, %v136_v32  ;;  %v282_v35 = vsel %vm278_vm1, %v136_v32, 0.0  ;;  %v309_v39 = vsel %vm278_vm1, %v299_v36, 0.0  ;;  %v626_v36 = vld [vmem:[%s1014_s3] ss:$0 sm:$0xff] }
  0xf3   :  { %v303_v38 = vsel %vm278_vm1, %v297_v33, 0.0 }
  0xf4   :  { %307 = vadd.xlane.f32.xlu1 %v306_v34  ;;  %283 = vadd.xlane.f32.xlu0 %v282_v35  ;;  %v670_v34 = vpop.f32.mrf.mxu1 }
  0xf8   :  { %289 = vadd.xlane.f32.xlu1 %v288_v37  ;;  %304 = vadd.xlane.f32.xlu0 %v303_v38 }
  0xfc   :  { %310 = vadd.xlane.f32.xlu1 %v309_v39  ;;  %v206_v39 = vpop.f32.mrf.mxu1 }
  0xfe   :  { %v671_v47 = vpop.f32.mrf.mxu1 }
 0x175   :  { %v287_v52 = vpop.xlane.xlu1 %286 }
 0x176   :  { %v294_v60 = vmul.f32 0.010416667, %v287_v52 }
 0x178   :  { %v318_v7 = vmul.f32 %v294_v60, %v294_v60  ;;  %v337_v35 = vsel %vm334_vm2, %v294_v60, %v240_v48 }
 0x179   :  { %v302_v58 = vpop.xlane.xlu0 %301  ;;  %v281_v59 = vpop.xlane.xlu1 %280  ;;  %v352_v40 = vmul.f32 %v626_v36, %v337_v35 }
 0x17a   :  { %v292_v61 = vmul.f32 0.010416667, %v281_v59  ;;  %v312_v1 = vmul.f32 0.010416667, %v302_v58 }
 0x17b   :  { %v356_v50 = vsub.f32 %v670_v34, %v352_v40  ;;  %v486_v40 = vld [vmem:[%s1016_s5 + $0x10] sm:$0xff] }
 0x17c   :  { %v316_v2 = vmul.f32 %v292_v61, %v292_v61  ;;  %v335_v32 = vsel %vm334_vm2, %v292_v61, %v238_v45  ;;  %v209_v61 = vpop.f32.mrf.mxu1 }
 0x17d   :  { %v308_v5 = vpop.xlane.xlu1 %307  ;;  %v284_v6 = vpop.xlane.xlu0 %283  ;;  %v350_v38 = vmul.f32 %v626_v36, %v335_v32 }
 0x17e   :  { %v320_v8 = vsub.f32 %v312_v1, %v316_v2  ;;  %v314_v9 = vmul.f32 0.010416667, %v308_v5  ;;  %v293_v10 = vmul.f32 0.010416667, %v284_v6 }
 0x17f   :  { %v354_v43 = vsub.f32 %v206_v39, %v350_v38  ;;  %v487_v39 = vld [vmem:[%s1016_s5 + $0x18] sm:$0xff] }
 0x180   :  { %v324_v15 = vadd.f32 1e-05, %v320_v8  ;;  %v322_v16 = vsub.f32 %v314_v9, %v318_v7  ;;  %v317_v17 = vmul.f32 %v293_v10, %v293_v10  ;;  %v336_v48 = vsel %vm334_vm2, %v293_v10, %v891_v55  ;;  %672 = vmatprep.subr.mxu0 %v487_v39  ;;  %686 = vmatprep.subr.mxu1 %v487_v39 }
 0x181   :  { %v290_v18 = vpop.xlane.xlu1 %289  ;;  %v305_v19 = vpop.xlane.xlu0 %304  ;;  %v351_v59 = vmul.f32 %v626_v36, %v336_v48  ;;  %673 = vmatpush3.msra.mxu0 %v487_v39  ;;  %690 = vmatpush3.msra.mxu1 %v487_v39 }
 0x182   :  { %714 = vrsqrt.f32 %v324_v15  ;;  %v326_v20 = vadd.f32 1e-05, %v322_v16  ;;  %v295_v21 = vmul.f32 0.010416667, %v290_v18  ;;  %v313_v22 = vmul.f32 0.010416667, %v305_v19  ;;  %674 = vmatprep.subr.mxu0 %v486_v40  ;;  %687 = vmatprep.subr.mxu1 %v486_v40 }
 0x183   :  { %716 = vrsqrt.f32 %v272_v11  ;;  %v355_v3 = vsub.f32 %v209_v61, %v351_v59  ;;  %675 = vmatpush3.msra.mxu0 %v486_v40  ;;  %691 = vmatpush3.msra.mxu1 %v486_v40 }
 0x184   :  { %718 = vrsqrt.f32 %v326_v20  ;;  %v321_v26 = vsub.f32 %v313_v22, %v317_v17  ;;  %v319_v28 = vmul.f32 %v295_v21, %v295_v21  ;;  %v338_v52 = vsel %vm334_vm2, %v295_v21, %v893_v56 }
 0x185   :  { %v311_v27 = vpop.xlane.xlu1 %310  ;;  %720 = vrsqrt.f32 %v271_v24  ;;  %v353_v63 = vmul.f32 %v626_v36, %v338_v52 }
 0x186   :  { %v325_v29 = vadd.f32 1e-05, %v321_v26  ;;  %v315_v30 = vmul.f32 0.010416667, %v311_v27 }
 0x187   :  { %v357_v8 = vsub.f32 %v671_v47, %v353_v63 }
 0x188   :  { %722 = vrsqrt.f32 %v325_v29  ;;  %v323_v33 = vsub.f32 %v315_v30, %v319_v28 }
 0x189   :  { %724 = vrsqrt.f32 %v273_v31 }
 0x18a   :  { %v327_v37 = vadd.f32 1e-05, %v323_v33 }
 0x18c   :  { %726 = vrsqrt.f32 %v327_v37 }
 0x18f   :  { %v715_v42 = vpop.eup %714 }
 0x190   :  { %v717_v44 = vpop.eup %716  ;;  %v339_v45 = vsel %vm334_vm2, %v715_v42, %v713_v41  ;;  %v485_v41 = vld [vmem:[%s1016_s5 + $0x8] sm:$0xff]  ;;  %v484_v42 = vld [vmem:[%s1016_s5] sm:$0xff] }
 0x191   :  { %v719_v49 = vpop.eup %718  ;;  %v358_v51 = vmul.f32 %v354_v43, %v339_v45  ;;  %676 = vmatprep.subr.mxu0 %v485_v41  ;;  %688 = vmatprep.subr.mxu1 %v485_v41 }
 0x192   :  { %v341_v53 = vsel %vm334_vm2, %v719_v49, %v717_v44  ;;  %v721_v55 = vpop.eup %720  ;;  %677 = vmatpush3.msra.mxu0 %v485_v41  ;;  %692 = vmatpush3.msra.mxu1 %v485_v41 }
 0x193   :  { %v921_v58 = vadd.f32 %v627_v46, %v358_v51  ;;  %v360_v60 = vmul.f32 %v356_v50, %v341_v53  ;;  %678 = vmatprep.subr.mxu0 %v484_v42  ;;  %689 = vmatprep.subr.mxu1 %v484_v42 }
 0x194   :  { %679 = vmatpush3.msra.mxu0 %v484_v42  ;;  %693 = vmatpush3.msra.mxu1 %v484_v42 }
 0x195   :  { %v723_v62 = vpop.eup %722  ;;  %v380_v0 = vsel %vm379_vm3, %v921_v58, 0.0  ;;  %v925_v56 = vadd.f32 %v627_v46, %v360_v60  ;;  %v404_v1 = vmul.f32 %v628_v57, %v921_v58  ;;  %v375_v11 = vmul.f32 %v921_v58, %v921_v58 }
 0x196   :  { %v340_v2 = vsel %vm334_vm2, %v723_v62, %v721_v55  ;;  %381 = vadd.xlane.f32.xlu0 %v380_v0  ;;  %v725_v6 = vpop.eup %724 }
 0x197   :  { %v386_v4 = vsel %vm379_vm3, %v925_v56, 0.0  ;;  %v406_v5 = vmul.f32 %v628_v57, %v925_v56  ;;  %v359_v9 = vmul.f32 %v355_v3, %v340_v2  ;;  %v408_v10 = vsel %vm379_vm3, %v404_v1, 0.0 }
 0x198   :  { %387 = vadd.xlane.f32.xlu1 %v386_v4  ;;  %v377_v14 = vmul.f32 %v925_v56, %v925_v56  ;;  %v392_v17 = vsel %vm379_vm3, %v375_v11, 0.0  ;;  %v420_v21 = vmul.f32 %v628_v57, %v375_v11 }
 0x199   :  { %v727_v7 = vpop.eup %726  ;;  %v414_v13 = vsel %vm379_vm3, %v406_v5, 0.0  ;;  %v941_v16 = vadd.f32 %v627_v46, %v359_v9 }
 0x19a   :  { %409 = vadd.xlane.f32.xlu0 %v408_v10  ;;  %v342_v12 = vsel %vm334_vm2, %v727_v7, %v725_v6  ;;  %v398_v18 = vsel %vm379_vm3, %v377_v14, 0.0  ;;  %v422_v23 = vmul.f32 %v628_v57, %v377_v14  ;;  %v424_v24 = vsel %vm379_vm3, %v420_v21, 0.0 }
 0x19b   :  { %v361_v15 = vmul.f32 %v357_v8, %v342_v12  ;;  %v383_v20 = vsel %vm379_vm3, %v941_v16, 0.0  ;;  %v405_v26 = vmul.f32 %v628_v57, %v941_v16  ;;  %v376_v30 = vmul.f32 %v941_v16, %v941_v16 }
 0x19c   :  { %415 = vadd.xlane.f32.xlu1 %v414_v13  ;;  %v430_v27 = vsel %vm379_vm3, %v422_v23, 0.0 }
 0x19d   :  { %v945_v19 = vadd.f32 %v627_v46, %v361_v15  ;;  %v411_v29 = vsel %vm379_vm3, %v405_v26, 0.0  ;;  %v395_v33 = vsel %vm379_vm3, %v376_v30, 0.0  ;;  %v421_v34 = vmul.f32 %v628_v57, %v376_v30 }
 0x19e   :  { %393 = vadd.xlane.f32.xlu0 %v392_v17 }
 0x19f   :  { %v389_v22 = vsel %vm379_vm3, %v945_v19, 0.0  ;;  %v407_v28 = vmul.f32 %v628_v57, %v945_v19  ;;  %v378_v32 = vmul.f32 %v945_v19, %v945_v19  ;;  %v427_v37 = vsel %vm379_vm3, %v421_v34, 0.0 }
 0x1a0   :  { %399 = vadd.xlane.f32.xlu1 %v398_v18 }
 0x1a1   :  { %v417_v31 = vsel %vm379_vm3, %v407_v28, 0.0  ;;  %v401_v35 = vsel %vm379_vm3, %v378_v32, 0.0  ;;  %v423_v36 = vmul.f32 %v628_v57, %v378_v32 }
 0x1a2   :  { %384 = vadd.xlane.f32.xlu0 %v383_v20 }
 0x1a3   :  { %v433_v38 = vsel %vm379_vm3, %v423_v36, 0.0 }
 0x1a4   :  { %390 = vadd.xlane.f32.xlu1 %v389_v22 }
 0x1a6   :  { %425 = vadd.xlane.f32.xlu0 %v424_v24 }
 0x1a8   :  { %431 = vadd.xlane.f32.xlu1 %v430_v27 }
 0x1aa   :  { %412 = vadd.xlane.f32.xlu0 %v411_v29 }
 0x1ac   :  { %418 = vadd.xlane.f32.xlu1 %v417_v31 }
 0x1ae   :  { %396 = vadd.xlane.f32.xlu0 %v395_v33 }
 0x1b0   :  { %402 = vadd.xlane.f32.xlu1 %v401_v35 }
 0x1b2   :  { %428 = vadd.xlane.f32.xlu0 %v427_v37 }
 0x1b4   :  { %434 = vadd.xlane.f32.xlu1 %v433_v38 }
 0x21f   :  { %v382_v43 = vpop.xlane.xlu0 %381 }
 0x221   :  { %v388_v44 = vpop.xlane.xlu1 %387 }
 0x223   :  { %v410_v45 = vpop.xlane.xlu0 %409 }
 0x224   :  { %v436_v48 = vsub.f32 %v382_v43, %v410_v45 }
 0x225   :  { %v416_v46 = vpop.xlane.xlu1 %415 }
 0x226   :  { %v438_v50 = vsub.f32 %v388_v44, %v416_v46  ;;  %v440_v52 = vsel %vm334_vm2, %v410_v45, %v436_v48 }
 0x227   :  { %v394_v47 = vpop.xlane.xlu0 %393  ;;  %v444_v57 = vmul.f32 0.0625, %v440_v52 }
 0x228   :  { %v442_v54 = vsel %vm334_vm2, %v416_v46, %v438_v50 }
 0x229   :  { %v400_v49 = vpop.xlane.xlu1 %399  ;;  %v446_v55 = vmul.f32 0.0625, %v442_v54  ;;  %v464_v0 = vmul.f32 %v444_v57, %v444_v57  ;;  %v460_v35 = vsub.f32 %v921_v58, %v444_v57 }
 0x22b   :  { %v385_v51 = vpop.xlane.xlu0 %384  ;;  %v466_v5 = vmul.f32 %v446_v55, %v446_v55  ;;  %v462_v38 = vsub.f32 %v925_v56, %v446_v55  ;;  %v629_v56 = vld [vmem:[%s1017_s6] ss:$0 sm:$0xff]  ;;  %s776_s6 = scalar_lea.vmem %s602_s8, 512 }
 0x22c   :  { %p777_p10 = scmp.ne.s32.totalorder %s602_s8, %s776_s6  ;;  %p782_p12 = scmp.lt.s32.totalorder %s776_s6, %s776_s6 }
 0x22d   :  { %v391_v53 = vpop.xlane.xlu1 %390 }
 0x22e   :  { %p783_p13 = por %p782_p12, %p781_p11 }
 0x22f   :  { %v426_v59 = vpop.xlane.xlu0 %425 }
 0x230   :  { %v448_v60 = vsub.f32 %v394_v47, %v426_v59  ;;  %p784_p0 = pnand %p783_p13, %p777_p10 }
 0x231   :  { %v432_v61 = vpop.xlane.xlu1 %431 }
 0x232   :  { %v452_v62 = vsel %vm334_vm2, %v426_v59, %v448_v60  ;;  %v450_v63 = vsub.f32 %v400_v49, %v432_v61 }
 0x233   :  { %v456_v1 = vmul.f32 0.0625, %v452_v62  ;;  %v413_v2 = vpop.xlane.xlu0 %412 }
 0x234   :  { %v454_v3 = vsel %vm334_vm2, %v432_v61, %v450_v63  ;;  %v437_v4 = vsub.f32 %v385_v51, %v413_v2 }
 0x235   :  { %v468_v6 = vsub.f32 %v456_v1, %v464_v0  ;;  %v458_v7 = vmul.f32 0.0625, %v454_v3  ;;  %v419_v8 = vpop.xlane.xlu1 %418 }
 0x236   :  { %v439_v9 = vsub.f32 %v391_v53, %v419_v8  ;;  %v441_v13 = vsel %vm334_vm2, %v413_v2, %v437_v4 }
 0x237   :  { %v472_v10 = vadd.f32 1e-05, %v468_v6  ;;  %v470_v11 = vsub.f32 %v458_v7, %v466_v5  ;;  %v397_v12 = vpop.xlane.xlu0 %396  ;;  %v445_v18 = vmul.f32 0.0625, %v441_v13 }
 0x238   :  { %v443_v17 = vsel %vm334_vm2, %v419_v8, %v439_v9 }
 0x239   :  { %728 = vrsqrt.f32 %v472_v10  ;;  %v474_v14 = vadd.f32 1e-05, %v470_v11  ;;  %v403_v15 = vpop.xlane.xlu1 %402  ;;  %v447_v22 = vmul.f32 0.0625, %v443_v17  ;;  %v465_v27 = vmul.f32 %v445_v18, %v445_v18 }
 0x23a   :  { %v461_v25 = vsub.f32 %v941_v16, %v445_v18 }
 0x23b   :  { %730 = vrsqrt.f32 %v474_v14  ;;  %v429_v20 = vpop.xlane.xlu0 %428  ;;  %v467_v30 = vmul.f32 %v447_v22, %v447_v22  ;;  %v463_v43 = vsub.f32 %v945_v19, %v447_v22 }
 0x23c   :  { %v449_v21 = vsub.f32 %v397_v12, %v429_v20 }
 0x23d   :  { %v435_v23 = vpop.xlane.xlu1 %434 }
 0x23e   :  { %v453_v24 = vsel %vm334_vm2, %v429_v20, %v449_v21  ;;  %v451_v26 = vsub.f32 %v403_v15, %v435_v23 }
 0x23f   :  { %v457_v28 = vmul.f32 0.0625, %v453_v24 }
 0x240   :  { %v455_v29 = vsel %vm334_vm2, %v435_v23, %v451_v26 }
 0x241   :  { %v469_v31 = vsub.f32 %v457_v28, %v465_v27  ;;  %v459_v32 = vmul.f32 0.0625, %v455_v29 }
 0x243   :  { %v473_v33 = vadd.f32 1e-05, %v469_v31  ;;  %v471_v34 = vsub.f32 %v459_v32, %v467_v30 }
 0x245   :  { %732 = vrsqrt.f32 %v473_v33  ;;  %v475_v36 = vadd.f32 1e-05, %v471_v34 }
 0x246   :  { %v729_v37 = vpop.eup %728 }
 0x247   :  { %734 = vrsqrt.f32 %v475_v36  ;;  %v480_v39 = vmul.f32 %v729_v37, %v460_v35 }
 0x248   :  { %v731_v40 = vpop.eup %730 }
 0x249   :  { %680 = vmatprep.mubr.msk.f32.mxu0 %vm379_vm3, %v480_v39  ;;  %v482_v41 = vmul.f32 %v731_v40, %v462_v38 }
 0x24b   :  { %683 = vmatprep.mubr.msk.f32.mxu1 %vm379_vm3, %v482_v41 }
 0x252   :  { %v733_v42 = vpop.eup %732 }
 0x253   :  { %v481_v44 = vmul.f32 %v733_v42, %v461_v25 }
 0x254   :  { %v735_v58 = vpop.eup %734 }
 0x255   :  { %681 = vmatmul.mubr.msk.f32.vlgmr.msra.gmra.mxu0 %vm379_vm3, %v481_v44  ;;  %v483_v45 = vmul.f32 %v735_v58, %v463_v43 }
 0x257   :  { %684 = vmatmul.mubr.msk.f32.vlgmr.msra.gmra.mxu1 %vm379_vm3, %v483_v45 }
 0x315   :  { %v682_v46 = vpop.f32.mrf.mxu0 }
 0x316   :  { %v579_v47 = vadd.f32 %v682_v46, %v629_v56 }
 0x317   :  { %v573_v48 = vpop.f32.mrf.mxu0  ;;  %v685_v49 = vpop.f32.mrf.mxu1 }
 0x318   :  { %593 = vst.msk [vmem:[#allocation7 + $0x8] sm:$0xff] %vm379_vm3, %v579_v47  ;;  %v574_v16 = vadd.f32 %v629_v56, %v573_v48  ;;  %v589_v19 = vadd.f32 %v685_v49, %v629_v56 }
 0x319   :  { %v583_v50 = vpop.f32.mrf.mxu1 }
 0x31a   :  { %592 = vst.msk [vmem:[#allocation7] sm:$0xff] %vm379_vm3, %v574_v16  ;;  %595 = vst.msk [vmem:[#allocation7 + $0x18] sm:$0xff] %vm379_vm3, %v589_v19  ;;  %v584_v51 = vadd.f32 %v629_v56, %v583_v50 }
 0x31c   :  { %594 = vst.msk [vmem:[#allocation7 + $0x10] sm:$0xff] %vm379_vm3, %v584_v51 }
 0x31d   :  { %787 = shalt.err (!%p784_p0)
}
 0x31e   :  { %s808_s9 = smov 128   ;;  %s809_s10 = smov 8  }
 0x31f   :  { %607 = dma.vmem_to_hbm [thread:$0]  %s602_s8, 512, %s1018_s7, [#allocation4], %s808_s9, %s808_s9, %s809_s10  }
 0x320   :  { %800 = dma.done.wait [#allocation4], 512  }
 0x321   :  { %801 = vsyncadd [#allocation4], 4294966784 }
 0x322   :  { %611 = vsyncpa [#allocation3], 1 }
 0x323   :  { %612 = vsyncpa [#allocation6], 1 }
 0x324   :  { %613 = vsyncpa [#allocation4], 1 }

</bundles_post_ra>
